<compile_context>
chip_gen: v7x
topology: tpu7x:2x2x1
jax: 0.10.0
libtpu: 0.0.40
codegen_flags: <defaults>
</compile_context>

<pallas_src>
import functools

import jax
import jax.numpy as jnp
from jax import lax
from jax.experimental import pallas as pl
from jax.experimental.pallas import tpu as pltpu


def _round_up(x: int, m: int) -> int:
    return (x + m - 1) // m * m


def _random_scores_kernel(seed_ref, o_ref, *, col_shift):
    # seed_ref: SMEM [1] int32 seed (derived from step_num).
    # o_ref:    VMEM [TILE_U, TILE_N] float32 output tile.
    # col_shift: static python int, log2 of the (power-of-2) row stride used
    #            to linearize the global (row, col) index.
    tile_u, tile_n = o_ref.shape

    row = lax.broadcasted_iota(jnp.int32, (tile_u, tile_n), 0).astype(jnp.uint32)
    col = lax.broadcasted_iota(jnp.int32, (tile_u, tile_n), 1).astype(jnp.uint32)
    row_off = (pl.program_id(0) * tile_u).astype(jnp.uint32)
    col_off = (pl.program_id(1) * tile_n).astype(jnp.uint32)

    # Global element counter for this tile.  Shift-based linearization: the
    # counter only needs uniqueness, so use a power-of-2 stride (one shift +
    # one OR instead of a 32-bit multiply per element).
    # NOTE: wraps (harmlessly repeats values) only if num_users * 2**col_shift
    # exceeds 2**32.
    ctr = ((row + row_off) << jnp.uint32(col_shift)) | (col + col_off)

    # Mix in the per-step seed (golden-ratio scramble -- scalar op), then hash
    # with the lowbias32 finalizer (2 vector int-muls per element).
    seed = seed_ref[0].astype(jnp.uint32) * jnp.uint32(0x9E3779B9)
    x = ctr ^ seed
    x = x ^ (x >> 16)
    x = x * jnp.uint32(0x7FEB352D)
    x = x ^ (x >> 15)
    x = x * jnp.uint32(0x846CA68B)
    x = x ^ (x >> 16)

    # Top 23 random bits -> mantissa of a float in [1, 2), then -1 -> [0, 1).
    # (Exponent bit trick: saves an int->float convert and a float multiply.)
    mant = (x >> 9) | jnp.uint32(0x3F800000)
    o_ref[...] = pltpu.bitcast(mant, jnp.float32) - jnp.float32(1.0)


# ~6 MiB per (double-buffered) output tile: big enough to sit near the HBM
# store roofline, small enough that 2x fits inside scoped VMEM on v5e/v6e/v7x.
_PER_BUF_BYTES = 6 * 1024 * 1024
_MAX_COL_TILE = 2048  # lanes per column tile when column tiling is possible


def random_model_forward(users_ids, users_items, users_rewards, step_num, num_items):
    """Pallas equivalent of Random.forward.

    users_ids:     [U]      int32   (only its static length is used)
    users_items:   [U, K]   int32   (unused, kept for signature parity)
    users_rewards: [U, K]   float32 (unused, kept for signature parity)
    step_num:      scalar   int32   (PRNG seed; deterministic per step)
    returns:       [U, num_items] float32, uniform in [0, 1)
    """
    del users_items, users_rewards  # torch.rand ignores these too
    num_users = users_ids.shape[0]

    # ---------------- column (item / lane) tiling ----------------
    needs_slice = False
    if num_items % 128 == 0:
        # Lane-aligned: tile the column dim in 128-multiples (caps VMEM for
        # arbitrarily wide catalogues and adds parallel grid steps).
        n_cols = num_items
        tn = min(n_cols, _MAX_COL_TILE)
        column_tiled = True
    elif 8 * num_items * 4 <= _PER_BUF_BYTES:
        # Unaligned but narrow enough: emit the exact last dim as one full-dim
        # block (only the tail vreg store is masked) -> no wrapper-side slice.
        n_cols = num_items
        tn = n_cols
        column_tiled = False
    else:
        # Very wide AND unaligned: pad to 128 lanes and slice afterwards.
        n_cols = _round_up(num_items, 128)
        tn = min(n_cols, _MAX_COL_TILE)
        column_tiled = True
        needs_slice = True

    # ---------------- row (user) tiling ----------------
    rows_budget = max(8, (_PER_BUF_BYTES // (4 * tn)) // 8 * 8)
    tile_u = min(_round_up(num_users, 8), rows_budget)

    gr = pl.cdiv(num_users, tile_u)
    gc = pl.cdiv(n_cols, tn)

    # v7x megacore: make sure there are >= 2 parallel grid tiles when possible
    # so both TensorCores get work.
    if gr * gc < 2:
        if column_tiled and tn >= 256:
            tn //= 2
            gc = pl.cdiv(n_cols, tn)
        elif num_users > 8:
            tile_u = max(8, _round_up(pl.cdiv(num_users, 2), 8))
            gr = pl.cdiv(num_users, tile_u)

    # Static power-of-2 row stride for the counter (covers the padded grid span).
    col_span = gc * tn
    col_shift = max(0, (col_span - 1).bit_length())

    seed = jnp.reshape(jnp.asarray(step_num, dtype=jnp.int32), (1,))

    kernel = functools.partial(_random_scores_kernel, col_shift=col_shift)

    out = pl.pallas_call(
        kernel,
        out_shape=jax.ShapeDtypeStruct((num_users, n_cols), jnp.float32),
        grid=(gr, gc),
        in_specs=[pl.BlockSpec(memory_space=pltpu.MemorySpace.SMEM)],
        out_specs=pl.BlockSpec((tile_u, tn), lambda i, j: (i, j)),
        compiler_params=pltpu.CompilerParams(
            dimension_semantics=("parallel", "parallel"),
            vmem_limit_bytes=32 * 1024 * 1024,
        ),
        cost_estimate=pl.CostEstimate(
            flops=0,
            transcendentals=0,
            bytes_accessed=4 * num_users * n_cols,
        ),
    )(seed)

    if needs_slice:
        # TODO(synk): only reachable for very wide, non-128-aligned num_items;
        # costs one extra HBM round trip of the output.
        out = out[:, :num_items]
    return out


if __name__ == "__main__":
    key = jax.random.PRNGKey(0)
    k1, k2, k3 = jax.random.split(key, 3)

    num_users = 8       # batch of users
    num_items = 128     # catalogue size (lane-dense last dim)
    hist_len = 16       # per-user interaction history length

    users_ids = jax.random.randint(k1, (num_users,), 0, 1000, dtype=jnp.int32)
    users_items = jax.random.randint(
        k2, (num_users, hist_len), 0, num_items, dtype=jnp.int32
    )
    users_rewards = jax.random.uniform(
        k3, (num_users, hist_len), dtype=jnp.float32
    )
    step_num = jnp.int32(7)

    out = random_model_forward(
        users_ids, users_items, users_rewards, step_num, num_items
    )
    out = jax.block_until_ready(out)

    assert out.shape == (num_users, num_items)
    assert out.dtype == jnp.float32
    assert bool(jnp.all(out >= 0.0)) and bool(jnp.all(out < 1.0))
    assert float(jnp.std(out)) > 0.01  # actually random, not constant

    # Different step -> different (but deterministic) scores.
    out2 = jax.block_until_ready(
        random_model_forward(
            users_ids, users_items, users_rewards, jnp.int32(8), num_items
        )
    )
    assert not bool(jnp.all(out == out2))

    # Non-multiple-of-128 catalogue: exercises the full-dim (no-slice) path.
    out3 = jax.block_until_ready(
        random_model_forward(users_ids, users_items, users_rewards, step_num, 192)
    )
    assert out3.shape == (num_users, 192)
    assert bool(jnp.all(out3 >= 0.0)) and bool(jnp.all(out3 < 1.0))
    assert float(jnp.std(out3)) > 0.01

    print("KERNEL_OK")
</pallas_src>

<mosaic_0001>
module attributes {stable_mosaic.version = 11 : i64} {
  func.func @_random_scores_kernel(%arg0: i32, %arg1: i32, %arg2: memref<1xi32, #tpu.memory_space<smem>>, %arg3: memref<8x128xf32, #tpu.memory_space<vmem>>) attributes {dimension_semantics = [#tpu.dimension_semantics<parallel>, #tpu.dimension_semantics<parallel>], iteration_bounds = array<i64: 1, 1>, scalar_prefetch = 0 : i64, scratch_operands = 0 : i64, tpu.core_type = #tpu.core_type<tc>, window_params = [{transform_indices = @transform_0, window_bounds = array<i64: 1>}, {transform_indices = @transform_1, window_bounds = array<i64: 8, 128>}]} {
    %0 = tpu.iota {dimensions = array<i32: 0>} : vector<8x128xi32>
    %1 = tpu.iota {dimensions = array<i32: 1>} : vector<8x128xi32>
    %c8_i32 = arith.constant 8 : i32
    %2 = arith.muli %arg0, %c8_i32 : i32
    %c128_i32 = arith.constant 128 : i32
    %3 = arith.muli %arg1, %c128_i32 : i32
    %4 = vector.broadcast %2 : i32 to vector<8x128xi32>
    %5 = arith.addi %0, %4 : vector<8x128xi32>
    %c7_i32 = arith.constant 7 : i32
    %6 = vector.broadcast %c7_i32 : i32 to vector<8x128xi32>
    %7 = arith.shli %5, %6 : vector<8x128xi32>
    %8 = vector.broadcast %3 : i32 to vector<8x128xi32>
    %9 = arith.addi %1, %8 : vector<8x128xi32>
    %10 = arith.ori %7, %9 : vector<8x128xi32>
    %c0 = arith.constant 0 : index
    %11 = memref.load %arg2[%c0] : memref<1xi32, #tpu.memory_space<smem>>
    %c-1640531527_i32 = arith.constant -1640531527 : i32
    %12 = arith.muli %11, %c-1640531527_i32 : i32
    %13 = vector.broadcast %12 : i32 to vector<8x128xi32>
    %14 = arith.xori %10, %13 : vector<8x128xi32>
    %c16_i32 = arith.constant 16 : i32
    %15 = vector.broadcast %c16_i32 : i32 to vector<8x128xi32>
    %16 = arith.shrui %14, %15 : vector<8x128xi32>
    %17 = arith.xori %14, %16 : vector<8x128xi32>
    %c2146121005_i32 = arith.constant 2146121005 : i32
    %18 = vector.broadcast %c2146121005_i32 : i32 to vector<8x128xi32>
    %19 = arith.muli %17, %18 : vector<8x128xi32>
    %c15_i32 = arith.constant 15 : i32
    %20 = vector.broadcast %c15_i32 : i32 to vector<8x128xi32>
    %21 = arith.shrui %19, %20 : vector<8x128xi32>
    %22 = arith.xori %19, %21 : vector<8x128xi32>
    %c-2073254261_i32 = arith.constant -2073254261 : i32
    %23 = vector.broadcast %c-2073254261_i32 : i32 to vector<8x128xi32>
    %24 = arith.muli %22, %23 : vector<8x128xi32>
    %c16_i32_0 = arith.constant 16 : i32
    %25 = vector.broadcast %c16_i32_0 : i32 to vector<8x128xi32>
    %26 = arith.shrui %24, %25 : vector<8x128xi32>
    %27 = arith.xori %24, %26 : vector<8x128xi32>
    %c9_i32 = arith.constant 9 : i32
    %28 = vector.broadcast %c9_i32 : i32 to vector<8x128xi32>
    %29 = arith.shrui %27, %28 : vector<8x128xi32>
    %c1065353216_i32 = arith.constant 1065353216 : i32
    %30 = vector.broadcast %c1065353216_i32 : i32 to vector<8x128xi32>
    %31 = arith.ori %29, %30 : vector<8x128xi32>
    %32 = tpu.bitcast %31 : vector<8x128xi32> -> vector<8x128xf32>
    %cst = arith.constant 1.000000e+00 : f32
    %33 = vector.broadcast %cst : f32 to vector<8x128xf32>
    %34 = arith.subf %32, %33 : vector<8x128xf32>
    %c0_1 = arith.constant 0 : index
    %c0_2 = arith.constant 0 : index
    %35 = vector.load %arg3[%c0_1, %c0_2] : memref<8x128xf32, #tpu.memory_space<vmem>>, vector<8x128xf32>
    tpu.vector_store %arg3[%c0_1, %c0_2], %34 {strides = array<i32>} : memref<8x128xf32, #tpu.memory_space<vmem>>, vector<8x128xf32>,
    return
  }
  func.func @transform_0(%arg0: i32, %arg1: i32) -> i32 {
    %c0_i32 = arith.constant 0 : i32
    %c0_i32_0 = arith.constant 0 : i32
    return %c0_i32 : i32
  }
  func.func @transform_1(%arg0: i32, %arg1: i32) -> (i32, i32) {
    %c0_i32 = arith.constant 0 : i32
    return %arg0, %arg1 : i32, i32
  }
}

</mosaic_0001>

<bundles_post_ra>
// kernel: tpu_custom_call.1
= control target key start
LH: loop header
LB: loop body
LE: loop exit
PB: predicated region body
PF: predicated region fallthrough
CT: control target
= control target key end

     0   :  { %v10_v0 = vlaneseq  ;;  %s105_s0 = inlined_call_operand.<no memory space> [shape: s32[1], index: 0, kind: input, shape index: {}]   ;;  %s106_s1 = inlined_call_operand.hbm [shape: f32[8,128], index: 1, kind: output, shape index: {}]  }
   0x1   :  { %7 = vsyncpa [#allocation4], 0  ;;  %s23_s8 = smul.u32 2654435769, %s105_s0  ;;  %s79_s9 = smov [#allocation3]  }
   0x2   :  { %v11_v1 = vshrl.u32 %v10_v0, 7  ;;  %v13_v2 = vand.u32 127, %v10_v0  ;;  %s45_s10 = sshll.u32 %s79_s9, 4  ;;  %s46_s10 = int_to_ptr.vmem [resolvable:$true] %s45_s10 }
   0x3   :  { %v24_v4 = vstv %s23_s8  ;;  %s55_s0 = scalar_lea.vmem %s46_s10, 128  ;;  %p60_p1 = scmp.lt.s32.totalorder %s46_s10, %s46_s10 }
   0x4   :  { %v18_v3 = vshll.u32 %v11_v1, 7  ;;  %p56_p0 = scmp.ne.s32.totalorder %s46_s10, %s55_s0  ;;  %p61_p2 = scmp.lt.s32.totalorder %s55_s0, %s55_s0 }
   0x6   :  { %v21_v5 = vor.u32 %v18_v3, %v13_v2  ;;  %p62_p3 = por %p61_p2, %p60_p1 }
   0x8   :  { %v25_v6 = vxor.u32 %v24_v4, %v21_v5  ;;  %p63_p4 = pnand %p62_p3, %p56_p0 }
   0xa   :  { %v26_v7 = vshrl.u32 %v25_v6, 16 }
   0xc   :  { %v27_v8 = vxor.u32 %v26_v7, %v25_v6 }
   0xe   :  { %v28_v9 = vmul.u32 2146121005, %v27_v8 }
  0x10   :  { %v29_v10 = vshrl.u32 %v28_v9, 15 }
  0x12   :  { %v30_v11 = vxor.u32 %v29_v10, %v28_v9 }
  0x14   :  { %v31_v12 = vmul.u32 2221713035, %v30_v11 }
  0x16   :  { %v32_v13 = vshrl.u32 %v31_v12, 16 }
  0x18   :  { %v33_v14 = vxor.u32 %v32_v13, %v31_v12 }
  0x1a   :  { %v34_v15 = vshrl.u32 %v33_v14, 9 }
  0x1c   :  { %v35_v16 = vor.u32 1065353216, %v34_v15 }
  0x1e   :  { %v53_v17 = vadd.f32 -1.0, %v35_v16 }
  0x20   :  { %38 = vst [vmem:[#allocation3] sm:$0xff] %v53_v17 }
  0x21   :  { %66 = shalt.err (!%p63_p4)
}
  0x22   :  { %s67_s13 = scalar_lea.hbm %s106_s1, 128 }
  0x23   :  { %p68_p5 = scmp.ne.s32.totalorder %s106_s1, %s67_s13  ;;  %p71_p6 = scmp.lt.u32.totalorder %s67_s13, %s106_s1 }
  0x25   :  { %p73_p7 = pnand %p71_p6, %p68_p5 }
  0x27   :  { %76 = shalt.err (!%p73_p7)
}
  0x28   :  { %48 = dma.vmem_to_hbm [thread:$0]  %s46_s10, 128, %s106_s1, [#allocation4]  }
  0x29   :  { %77 = dma.done.wait [#allocation4], 128  }
  0x2a   :  { %78 = vsyncadd [#allocation4], 4294967168 }
  0x2b   :  { %52 = vsyncpa [#allocation4], 1 }

</bundles_post_ra>
